<compile_context>
chip_gen: v7x
topology: tpu7x:2x2x1
jax: 0.10.0
libtpu: 0.0.40
codegen_flags: <defaults>
</compile_context>

<pallas_src>
import jax
import jax.numpy as jnp
from jax.experimental import pallas as pl
from jax.experimental.pallas import tpu as pltpu


# ----------------------------- model config ---------------------------------
B = 2              # batch per tower
L = 16             # sequence length
D = 32             # embedding dim
V = 32             # vocab size
CO = 4             # kernel_num (Co)
KS = (3, 4, 5)     # kernel_sizes
C_OUT = 3          # output_num (C)
H = len(KS) * CO   # 12 : MLP hidden / feature width

# ----------------------------- kernel layout ---------------------------------
N_TOWERS = 2
KMAX = max(KS)                     # 5
HP = 128                           # lane-padded feature width
LP = ((L + 7) // 8) * 8            # per-sequence row block (sublane aligned) = 16
N_SEQ = N_TOWERS * B               # 4  sequences total (both towers fused)
NPT = N_SEQ * LP                   # 64 window-start rows (both towers fused)
KV = KMAX * V                      # 160 folded contraction depth


# ------------------------------- kernel --------------------------------------
def _siamese_fused_kernel(code_ref, wfold_ref, bias_ref, mask_ref, fcw_ref, out_ref):
    """Both towers in one step: folded embed+conv matmul -> ReLU -> mask ->
    max-pool -> MLP head."""
    bias = bias_ref[...]                                                 # (4, HP) f32

    # ---- shifted one-hot built in-kernel (code[t, k*V+v] == 0 <=> id match) ----
    onehot = (code_ref[...] == 0).astype(jnp.float32).astype(jnp.bfloat16)  # (NPT, KV)

    # ---- embedding + all three convs as ONE folded MXU contraction ----
    acc = jnp.dot(onehot, wfold_ref[...],
                  preferred_element_type=jnp.float32)                   # (NPT, HP)
    # conv bias + ReLU, then host-precomputed time-validity mask (0 is neutral
    # for the subsequent max-pool since ReLU output is >= 0).
    acc = jnp.maximum(acc + bias[0:1, :], 0.0) * mask_ref[...]

    # ---- global max-pool over time, per sequence (layout-free reshape) ----
    feat = jnp.max(acc.reshape(N_SEQ, LP, HP), axis=1)                   # (N_SEQ, HP)

    # ---- MLP head (fc1 Sequential); Dropout -> identity (inference) ----
    h = jnp.maximum(jnp.dot(feat.astype(jnp.bfloat16), fcw_ref[0],
                            preferred_element_type=jnp.float32) + bias[1:2, :], 0.0)
    h = jnp.maximum(jnp.dot(h.astype(jnp.bfloat16), fcw_ref[1],
                            preferred_element_type=jnp.float32) + bias[2:3, :], 0.0)
    out = jnp.dot(h.astype(jnp.bfloat16), fcw_ref[2],
                  preferred_element_type=jnp.float32) + bias[3:4, :]
    out_ref[...] = out.astype(out_ref.dtype)                             # (N_SEQ, HP)


def _siamese_pallas(code, wfold, bias, mask, fc_w):
    return pl.pallas_call(
        _siamese_fused_kernel,
        out_shape=jax.ShapeDtypeStruct((N_SEQ, HP), jnp.float32),
        grid=(1,),
        in_specs=[
            pl.BlockSpec((NPT, KV), lambda i: (0, 0)),        # shifted id codes (int32)
            pl.BlockSpec((KV, HP), lambda i: (0, 0)),         # folded embed+conv weights (bf16)
            pl.BlockSpec((4, HP), lambda i: (0, 0)),          # packed biases (f32)
            pl.BlockSpec((NPT, HP), lambda i: (0, 0)),        # static time-validity mask (f32)
            pl.BlockSpec((3, HP, HP), lambda i: (0, 0, 0)),   # packed fc weights (bf16)
        ],
        out_specs=pl.BlockSpec((N_SEQ, HP), lambda i: (0, 0)),  # lane-dense output
        compiler_params=pltpu.CompilerParams(
            dimension_semantics=("arbitrary",),
            vmem_limit_bytes=4 * 1024 * 1024,                 # <1 MiB resident; small budget
        ),
    )(code, wfold, bias, mask, fc_w)


# --------------------------- host-side packing --------------------------------
def _prepare_code(ids1, ids2):
    """(B, L) ids per tower -> (NPT, KV) int32 codes.

    code[row, k*V + v] = ids[tower, b, t + k] - v  (sentinel V past each
    sequence end, which never matches v < V -> zero one-hot contribution).
    Row layout: tower-major, then batch, then time (NPT = 2*B*LP rows).
    """
    ids = jnp.stack([ids1, ids2], axis=0).astype(jnp.int32)              # (2, B, L)
    ext = jnp.full((N_TOWERS, B, LP + KMAX - 1), V, dtype=jnp.int32)
    ext = ext.at[:, :, :L].set(ids)
    shifted = jnp.stack([ext[:, :, k:k + LP] for k in range(KMAX)], axis=-1)  # (2,B,LP,KMAX)
    code = shifted[..., None] - jnp.arange(V, dtype=jnp.int32)                # (2,B,LP,KMAX,V)
    return code.reshape(NPT, KV)


def _make_time_mask():
    """Static (NPT, HP) 0/1 mask: position t is valid for kernel-size group i
    iff t < L - K_i + 1; padded lanes (col >= H) are zeroed too."""
    col = jnp.arange(HP)
    tmax = jnp.zeros((HP,), jnp.int32)
    for i, K in enumerate(KS):
        tmax = jnp.where(col // CO == i, L - K + 1, tmax)
    tmax = jnp.where(col < H, tmax, 0)
    m = (jnp.arange(LP)[:, None] < tmax[None, :]).astype(jnp.float32)    # (LP, HP)
    return jnp.tile(m, (N_SEQ, 1))                                       # (NPT, HP)


def pack_params(params):
    """Fold embedding into conv weights and pack everything into 3 slabs."""
    tbl = params["embed_table"]                                          # (V, D) f32
    wfold = jnp.zeros((KV, HP), jnp.float32)
    bias = jnp.zeros((4, HP), jnp.float32)
    for i, K in enumerate(KS):
        w = params[f"conv_w_{K}"]                                        # (CO, K, D)
        # fold[k*V + v, c] = sum_d tbl[v, d] * w[c, k, d]
        fold = jnp.einsum("vd,ckd->kvc", tbl, w).reshape(K * V, CO)
        wfold = wfold.at[:K * V, i * CO:(i + 1) * CO].set(fold)
        bias = bias.at[0, i * CO:(i + 1) * CO].set(params[f"conv_b_{K}"])
    bias = bias.at[1, :H].set(params["fc1_b"])
    bias = bias.at[2, :H].set(params["fc2_b"])
    bias = bias.at[3, :C_OUT].set(params["fc3_b"])
    fc_w = jnp.zeros((3, HP, HP), jnp.float32)
    fc_w = fc_w.at[0, :H, :H].set(params["fc1_w"])
    fc_w = fc_w.at[1, :H, :H].set(params["fc2_w"])
    fc_w = fc_w.at[2, :H, :C_OUT].set(params["fc3_w"])
    return wfold.astype(jnp.bfloat16), bias, fc_w.astype(jnp.bfloat16)


def siamese_forward(ids1, ids2, params):
    """Full SiameseNetwork.forward: returns (output1, output2), each (B, C)."""
    wfold, bias, fc_w = pack_params(params)      # tiny; in practice pack once & reuse
    mask = _make_time_mask()                     # static; in practice a constant
    code = _prepare_code(ids1, ids2)             # (NPT, KV) int32
    out = _siamese_pallas(code, wfold, bias, mask, fc_w)   # (N_SEQ, HP)
    out = out.reshape(N_TOWERS, B, HP)[:, :, :C_OUT]       # strip lane padding
    return out[0], out[1]


# --------------------------- parameter setup ----------------------------------
def init_params(key):
    params = {}
    keys = jax.random.split(key, 2 * len(KS) + 7)
    ki = 0
    params["embed_table"] = 0.1 * jax.random.normal(keys[ki], (V, D), jnp.float32); ki += 1
    for K in KS:
        params[f"conv_w_{K}"] = 0.1 * jax.random.normal(keys[ki], (CO, K, D), jnp.float32); ki += 1
        params[f"conv_b_{K}"] = 0.01 * jax.random.normal(keys[ki], (CO,), jnp.float32); ki += 1
    params["fc1_w"] = 0.1 * jax.random.normal(keys[ki], (H, H), jnp.float32); ki += 1
    params["fc1_b"] = 0.01 * jax.random.normal(keys[ki], (H,), jnp.float32); ki += 1
    params["fc2_w"] = 0.1 * jax.random.normal(keys[ki], (H, H), jnp.float32); ki += 1
    params["fc2_b"] = 0.01 * jax.random.normal(keys[ki], (H,), jnp.float32); ki += 1
    params["fc3_w"] = 0.1 * jax.random.normal(keys[ki], (H, C_OUT), jnp.float32); ki += 1
    params["fc3_b"] = 0.01 * jax.random.normal(keys[ki], (C_OUT,), jnp.float32); ki += 1
    return params


# ------------------------ pure-JAX reference (spec) ----------------------------
def reference_tower(ids, params):
    emb = params["embed_table"][ids]                                     # (B, L, D)
    feats = []
    for K in KS:
        w = params[f"conv_w_{K}"]                                        # (CO, K, D)
        b = params[f"conv_b_{K}"]                                        # (CO,)
        T = L - K + 1
        win = jnp.stack([emb[:, t:t + K, :] for t in range(T)], axis=1)  # (B, T, K, D)
        s = jnp.einsum("btkd,ckd->btc", win, w) + b[None, None, :]
        feats.append(jnp.max(jnp.maximum(s, 0.0), axis=1))               # (B, CO)
    feat = jnp.concatenate(feats, axis=-1)                               # (B, H)
    h = jnp.maximum(feat @ params["fc1_w"] + params["fc1_b"], 0.0)
    h = jnp.maximum(h @ params["fc2_w"] + params["fc2_b"], 0.0)
    return h @ params["fc3_w"] + params["fc3_b"]


# --------------------------------- main ----------------------------------------
if __name__ == "__main__":
    key = jax.random.PRNGKey(0)
    k_params, k_ids1, k_ids2 = jax.random.split(key, 3)

    params = init_params(k_params)
    ids1 = jax.random.randint(k_ids1, (B, L), 0, V, dtype=jnp.int32)
    ids2 = jax.random.randint(k_ids2, (B, L), 0, V, dtype=jnp.int32)

    fwd = jax.jit(siamese_forward)
    out1, out2 = fwd(ids1, ids2, params)
    jax.block_until_ready((out1, out2))

    assert out1.shape == (B, C_OUT) and out2.shape == (B, C_OUT)
    ref1 = reference_tower(ids1, params)
    ref2 = reference_tower(ids2, params)
    assert jnp.allclose(out1, ref1, atol=2e-2, rtol=2e-2)
    assert jnp.allclose(out2, ref2, atol=2e-2, rtol=2e-2)
    print("KERNEL_OK")
</pallas_src>

<mosaic_0001>
module attributes {stable_mosaic.version = 11 : i64} {
  func.func @_siamese_fused_kernel(%arg0: i32, %arg1: memref<64x160xi32, #tpu.memory_space<vmem>>, %arg2: memref<160x128xbf16, #tpu.memory_space<vmem>>, %arg3: memref<4x128xf32, #tpu.memory_space<vmem>>, %arg4: memref<64x128xf32, #tpu.memory_space<vmem>>, %arg5: memref<3x128x128xbf16, #tpu.memory_space<vmem>>, %arg6: memref<4x128xf32, #tpu.memory_space<vmem>>) attributes {dimension_semantics = [#tpu.dimension_semantics<arbitrary>], iteration_bounds = array<i64: 1>, scalar_prefetch = 0 : i64, scratch_operands = 0 : i64, tpu.core_type = #tpu.core_type<tc>, window_params = [{pipeline_mode = #tpu.pipeline_mode<synchronous>, transform_indices = @transform_0, window_bounds = array<i64: 64, 160>}, {pipeline_mode = #tpu.pipeline_mode<synchronous>, transform_indices = @transform_1, window_bounds = array<i64: 160, 128>}, {pipeline_mode = #tpu.pipeline_mode<synchronous>, transform_indices = @transform_2, window_bounds = array<i64: 4, 128>}, {pipeline_mode = #tpu.pipeline_mode<synchronous>, transform_indices = @transform_3, window_bounds = array<i64: 64, 128>}, {pipeline_mode = #tpu.pipeline_mode<synchronous>, transform_indices = @transform_4, window_bounds = array<i64: 3, 128, 128>}, {pipeline_mode = #tpu.pipeline_mode<synchronous>, transform_indices = @transform_5, window_bounds = array<i64: 4, 128>}]} {
    %c0 = arith.constant 0 : index
    %c0_0 = arith.constant 0 : index
    %0 = vector.load %arg3[%c0, %c0_0] : memref<4x128xf32, #tpu.memory_space<vmem>>, vector<4x128xf32>
    %c0_1 = arith.constant 0 : index
    %c0_2 = arith.constant 0 : index
    %1 = vector.load %arg1[%c0_1, %c0_2] : memref<64x160xi32, #tpu.memory_space<vmem>>, vector<64x160xi32>
    %c0_i32 = arith.constant 0 : i32
    %2 = vector.broadcast %c0_i32 : i32 to vector<64x160xi32>
    %3 = arith.cmpi eq, %1, %2 : vector<64x160xi32>
    %4 = arith.extui %3 : vector<64x160xi1> to vector<64x160xi32>
    %5 = arith.sitofp %4 : vector<64x160xi32> to vector<64x160xf32>
    %6 = arith.truncf %5 : vector<64x160xf32> to vector<64x160xbf16>
    %c0_3 = arith.constant 0 : index
    %c0_4 = arith.constant 0 : index
    %7 = vector.load %arg2[%c0_3, %c0_4] : memref<160x128xbf16, #tpu.memory_space<vmem>>, vector<160x128xbf16>
    %cst = arith.constant dense<0.000000e+00> : vector<64x128xf32>
    %8 = tpu.matmul %6, %7, %cst {dimension_numbers = #tpu.dot_dimension_numbers<[1], [0], [0], [1], [0, 0, 1, 1], [], []>} : vector<64x160xbf16>, vector<160x128xbf16>, vector<64x128xf32> -> vector<64x128xf32>
    %9 = vector.extract_strided_slice %0 {offsets = [0, 0], sizes = [1, 128], strides = [1, 1]} : vector<4x128xf32> to vector<1x128xf32>
    %10 = vector.broadcast %9 : vector<1x128xf32> to vector<64x128xf32>
    %11 = arith.addf %8, %10 : vector<64x128xf32>
    %cst_5 = arith.constant 0.000000e+00 : f32
    %12 = vector.broadcast %cst_5 : f32 to vector<64x128xf32>
    %13 = arith.maximumf %11, %12 : vector<64x128xf32>
    %c0_6 = arith.constant 0 : index
    %c0_7 = arith.constant 0 : index
    %14 = vector.load %arg4[%c0_6, %c0_7] : memref<64x128xf32, #tpu.memory_space<vmem>>, vector<64x128xf32>
    %15 = arith.mulf %13, %14 : vector<64x128xf32>
    %16 = vector.shape_cast %15 : vector<64x128xf32> to vector<4x16x128xf32>
    %cst_8 = arith.constant dense<0xFF800000> : vector<4x128xf32>
    %17 = vector.multi_reduction <maximumf>, %16, %cst_8 [1] : vector<4x16x128xf32> to vector<4x128xf32>
    %18 = arith.truncf %17 : vector<4x128xf32> to vector<4x128xbf16>
    %c0_9 = arith.constant 0 : index
    %c0_10 = arith.constant 0 : index
    %c0_11 = arith.constant 0 : index
    %19 = vector.load %arg5[%c0_9, %c0_10, %c0_11] : memref<3x128x128xbf16, #tpu.memory_space<vmem>>, vector<1x128x128xbf16>
    %20 = vector.shape_cast %19 : vector<1x128x128xbf16> to vector<128x128xbf16>
    %cst_12 = arith.constant dense<0.000000e+00> : vector<4x128xf32>
    %21 = tpu.matmul %18, %20, %cst_12 {dimension_numbers = #tpu.dot_dimension_numbers<[1], [0], [0], [1], [0, 0, 1, 1], [], []>} : vector<4x128xbf16>, vector<128x128xbf16>, vector<4x128xf32> -> vector<4x128xf32>
    %22 = vector.extract_strided_slice %0 {offsets = [1, 0], sizes = [1, 128], strides = [1, 1]} : vector<4x128xf32> to vector<1x128xf32>
    %23 = vector.broadcast %22 : vector<1x128xf32> to vector<4x128xf32>
    %24 = arith.addf %21, %23 : vector<4x128xf32>
    %cst_13 = arith.constant 0.000000e+00 : f32
    %25 = vector.broadcast %cst_13 : f32 to vector<4x128xf32>
    %26 = arith.maximumf %24, %25 : vector<4x128xf32>
    %27 = arith.truncf %26 : vector<4x128xf32> to vector<4x128xbf16>
    %c1 = arith.constant 1 : index
    %c0_14 = arith.constant 0 : index
    %c0_15 = arith.constant 0 : index
    %28 = vector.load %arg5[%c1, %c0_14, %c0_15] : memref<3x128x128xbf16, #tpu.memory_space<vmem>>, vector<1x128x128xbf16>
    %29 = vector.shape_cast %28 : vector<1x128x128xbf16> to vector<128x128xbf16>
    %cst_16 = arith.constant dense<0.000000e+00> : vector<4x128xf32>
    %30 = tpu.matmul %27, %29, %cst_16 {dimension_numbers = #tpu.dot_dimension_numbers<[1], [0], [0], [1], [0, 0, 1, 1], [], []>} : vector<4x128xbf16>, vector<128x128xbf16>, vector<4x128xf32> -> vector<4x128xf32>
    %31 = vector.extract_strided_slice %0 {offsets = [2, 0], sizes = [1, 128], strides = [1, 1]} : vector<4x128xf32> to vector<1x128xf32>
    %32 = vector.broadcast %31 : vector<1x128xf32> to vector<4x128xf32>
    %33 = arith.addf %30, %32 : vector<4x128xf32>
    %cst_17 = arith.constant 0.000000e+00 : f32
    %34 = vector.broadcast %cst_17 : f32 to vector<4x128xf32>
    %35 = arith.maximumf %33, %34 : vector<4x128xf32>
    %36 = arith.truncf %35 : vector<4x128xf32> to vector<4x128xbf16>
    %c2 = arith.constant 2 : index
    %c0_18 = arith.constant 0 : index
    %c0_19 = arith.constant 0 : index
    %37 = vector.load %arg5[%c2, %c0_18, %c0_19] : memref<3x128x128xbf16, #tpu.memory_space<vmem>>, vector<1x128x128xbf16>
    %38 = vector.shape_cast %37 : vector<1x128x128xbf16> to vector<128x128xbf16>
    %cst_20 = arith.constant dense<0.000000e+00> : vector<4x128xf32>
    %39 = tpu.matmul %36, %38, %cst_20 {dimension_numbers = #tpu.dot_dimension_numbers<[1], [0], [0], [1], [0, 0, 1, 1], [], []>} : vector<4x128xbf16>, vector<128x128xbf16>, vector<4x128xf32> -> vector<4x128xf32>
    %40 = vector.extract_strided_slice %0 {offsets = [3, 0], sizes = [1, 128], strides = [1, 1]} : vector<4x128xf32> to vector<1x128xf32>
    %41 = vector.broadcast %40 : vector<1x128xf32> to vector<4x128xf32>
    %42 = arith.addf %39, %41 : vector<4x128xf32>
    %c0_21 = arith.constant 0 : index
    %c0_22 = arith.constant 0 : index
    %43 = vector.load %arg6[%c0_21, %c0_22] : memref<4x128xf32, #tpu.memory_space<vmem>>, vector<4x128xf32>
    tpu.vector_store %arg6[%c0_21, %c0_22], %42 {strides = array<i32>} : memref<4x128xf32, #tpu.memory_space<vmem>>, vector<4x128xf32>,
    return
  }
  func.func @transform_0(%arg0: i32) -> (i32, i32) {
    %c0_i32 = arith.constant 0 : i32
    %c0_i32_0 = arith.constant 0 : i32
    %c0_i32_1 = arith.constant 0 : i32
    return %c0_i32, %c0_i32_0 : i32, i32
  }
  func.func @transform_1(%arg0: i32) -> (i32, i32) {
    %c0_i32 = arith.constant 0 : i32
    %c0_i32_0 = arith.constant 0 : i32
    %c0_i32_1 = arith.constant 0 : i32
    return %c0_i32, %c0_i32_0 : i32, i32
  }
  func.func @transform_2(%arg0: i32) -> (i32, i32) {
    %c0_i32 = arith.constant 0 : i32
    %c0_i32_0 = arith.constant 0 : i32
    %c0_i32_1 = arith.constant 0 : i32
    return %c0_i32, %c0_i32_0 : i32, i32
  }
  func.func @transform_3(%arg0: i32) -> (i32, i32) {
    %c0_i32 = arith.constant 0 : i32
    %c0_i32_0 = arith.constant 0 : i32
    %c0_i32_1 = arith.constant 0 : i32
    return %c0_i32, %c0_i32_0 : i32, i32
  }
  func.func @transform_4(%arg0: i32) -> (i32, i32, i32) {
    %c0_i32 = arith.constant 0 : i32
    %c0_i32_0 = arith.constant 0 : i32
    %c0_i32_1 = arith.constant 0 : i32
    %c0_i32_2 = arith.constant 0 : i32
    return %c0_i32, %c0_i32_0, %c0_i32_1 : i32, i32, i32
  }
  func.func @transform_5(%arg0: i32) -> (i32, i32) {
    %c0_i32 = arith.constant 0 : i32
    %c0_i32_0 = arith.constant 0 : i32
    %c0_i32_1 = arith.constant 0 : i32
    return %c0_i32, %c0_i32_0 : i32, i32
  }
}

</mosaic_0001>

<bundles_post_ra>
// kernel: siamese_forward.1
= control target key start
LH: loop header
LB: loop body
LE: loop exit
PB: predicated region body
PF: predicated region fallthrough
CT: control target
= control target key end

     0   :  { %v882_v0 = vmov 0   ;;  %v883_v2 = vmov 0.0   ;;  %vm178_vm2 = vcmask 261120   ;;  %v884_v28 = vmov 1.0|1.0   ;;  %s1150_s1 = inlined_call_operand.vmem [shape: bf16[160,128], index: 1, kind: input, shape index: {}]   ;;  %s1151_s0 = inlined_call_operand.vmem [shape: s32[64,160], index: 0, kind: input, shape index: {}]   ;;  %s1152_s4 = inlined_call_operand.vmem [shape: bf16[3,128,128], index: 4, kind: input, shape index: {}]   ;;  %s1153_s2 = inlined_call_operand.vmem [shape: f32[4,128], index: 2, kind: input, shape index: {}]   ;;  %s1154_s3 = inlined_call_operand.vmem [shape: f32[64,128], index: 3, kind: input, shape index: {}]   ;;  %s1155_s5 = inlined_call_operand.vmem [shape: f32[4,128], index: 5, kind: output, shape index: {}]  }
   0x1   :  { %191 = vmatprep.subr.bf16.mxu0 %v882_v0  ;;  %v848_v1 = vld [vmem:[%s1150_s1] sm:$0xff]   ;;  %784 = vmatprep.subr.bf16.mxu1 %v883_v2  ;;  %v849_v3 = vld [vmem:[%s1150_s1 + $0x8] sm:$0xff]   ;;  %v850_v4 = vld [vmem:[%s1150_s1 + $0x10] sm:$0xff]   ;;  %v114_v49 = vlaneseq }
   0x2   :  { %192 = vmatpush1.bf16.msra.mxu0 %v848_v1  ;;  %v851_v5 = vld [vmem:[%s1150_s1 + $0x18] sm:$0xff]   ;;  %v23_v6 = vld [vmem:[%s1151_s0 + $0x8] sm:$0xff]  ;;  %v852_v11 = vld [vmem:[%s1150_s1 + $0x20] sm:$0xff]  }
   0x3   :  { %193 = vmatprep.subr.bf16.mxu0 %v882_v0  ;;  %v25_v7 = vld [vmem:[%s1151_s0 + $0x18] sm:$0xff]  ;;  %vm39_vm0 = vcmp.eq.s32.totalorder %v23_v6, 0  ;;  %v853_v12 = vld [vmem:[%s1150_s1 + $0x28] sm:$0xff]   ;;  %v854_v13 = vld [vmem:[%s1150_s1 + $0x30] sm:$0xff]   ;;  %v1044_v50 = vshrl.u32 %v114_v49, 7 }
   0x4   :  { %vm41_vm1 = vcmp.eq.s32.totalorder %v25_v7, 0  ;;  %v664_v8 = vsel %vm39_vm0, 1.0, %v883_v2  ;;  %v855_v14 = vld [vmem:[%s1150_s1 + $0x38] sm:$0xff]   ;;  %v27_v15 = vld [vmem:[%s1151_s0 + $0x28] sm:$0xff]  ;;  %v856_v17 = vld [vmem:[%s1150_s1 + $0x40] sm:$0xff]  }
   0x5   :  { %v666_v9 = vsel %vm41_vm1, 1.0, %v883_v2  ;;  %v29_v16 = vld [vmem:[%s1151_s0 + $0x38] sm:$0xff]  ;;  %v22_v18 = vld [vmem:[%s1151_s0] sm:$0xff]  ;;  %v24_v19 = vld [vmem:[%s1151_s0 + $0x10] sm:$0xff]  ;;  %vm43_vm3 = vcmp.eq.s32.totalorder %v27_v15, 0  ;;  %v116_v51 = vsub.s32 0, %v1044_v50 }
   0x6   :  { %194 = vmatpush1.bf16.msra.mxu0 %v849_v3  ;;  %v87_v10 = vpack.c.bf16 %v666_v9, %v664_v8  ;;  %vm45_vm4 = vcmp.eq.s32.totalorder %v29_v16, 0  ;;  %v857_v20 = vld [vmem:[%s1150_s1 + $0x48] sm:$0xff]   ;;  %vm38_vm5 = vcmp.eq.s32.totalorder %v22_v18, 0  ;;  %vm40_vm6 = vcmp.eq.s32.totalorder %v24_v19, 0  ;;  %v33_v24 = vld [vmem:[%s1151_s0 + $0x58] sm:$0xff]  ;;  %v26_v26 = vld [vmem:[%s1151_s0 + $0x20] sm:$0xff] }
   0x7   :  { %195 = vmatprep.subr.bf16.mxu0 %v882_v0  ;;  %v668_v21 = vsel %vm43_vm3, 1.0, %v883_v2  ;;  %v670_v22 = vsel %vm45_vm4, 1.0, %v883_v2  ;;  %v31_v23 = vld [vmem:[%s1151_s0 + $0x48] sm:$0xff]  ;;  %vm690_vm7 = vmpackc.low %vm40_vm6, %vm38_vm5  ;;  %v28_v27 = vld [vmem:[%s1151_s0 + $0x30] sm:$0xff]  ;;  %vm49_vm9 = vcmp.eq.s32.totalorder %v33_v24, 0  ;;  %vm42_vm10 = vcmp.eq.s32.totalorder %v26_v26, 0 }
   0x8   :  { %689 = vmatprep.mubr.msk.bf16.mxu0 %vm178_vm2, %v87_v10  ;;  %v89_v25 = vpack.c.bf16 %v670_v22, %v668_v21  ;;  %vm47_vm8 = vcmp.eq.s32.totalorder %v31_v23, 0  ;;  %vm44_vm11 = vcmp.eq.s32.totalorder %v28_v27, 0  ;;  %v674_v30 = vsel %vm49_vm9, 1.0, %v883_v2  ;;  %v35_v31 = vld [vmem:[%s1151_s0 + $0x68] sm:$0xff]  ;;  %v37_v32 = vld [vmem:[%s1151_s0 + $0x78] sm:$0xff]  ;;  %v30_v34 = vld [vmem:[%s1151_s0 + $0x40] sm:$0xff] }
   0x9   :  { %v672_v29 = vsel %vm47_vm8, 1.0, %v883_v2  ;;  %vm693_vm12 = vmpackc.low %vm44_vm11, %vm42_vm10  ;;  %v32_v35 = vld [vmem:[%s1151_s0 + $0x50] sm:$0xff]  ;;  %vm51_vm13 = vcmp.eq.s32.totalorder %v35_v31, 0  ;;  %vm53_vm14 = vcmp.eq.s32.totalorder %v37_v32, 0  ;;  %vm46_vm15 = vcmp.eq.s32.totalorder %v30_v34, 0  ;;  %v34_v39 = vld [vmem:[%s1151_s0 + $0x60] sm:$0xff] }
   0xa   :  { %196 = vmatpush1.bf16.msra.mxu0 %v850_v4  ;;  %v91_v33 = vpack.c.bf16 %v674_v30, %v672_v29  ;;  %vm48_vm0 = vcmp.eq.s32.totalorder %v32_v35, 0  ;;  %v676_v36 = vsel %vm51_vm13, 1.0, %v883_v2  ;;  %v678_v37 = vsel %vm53_vm14, 1.0, %v883_v2  ;;  %v36_v40 = vld [vmem:[%s1151_s0 + $0x70] sm:$0xff]  ;;  %v858_v41 = vld [vmem:[%s1152_s4] sm:$0xff]   ;;  %v859_v42 = vld [vmem:[%s1152_s4 + $0x8] sm:$0xff]  }
   0xb   :  { %197 = vmatprep.subr.bf16.mxu0 %v882_v0  ;;  %vm696_vm1 = vmpackc.low %vm48_vm0, %vm46_vm15  ;;  %v93_v38 = vpack.c.bf16 %v678_v37, %v676_v36  ;;  %vm50_vm3 = vcmp.eq.s32.totalorder %v34_v39, 0  ;;  %vm52_vm4 = vcmp.eq.s32.totalorder %v36_v40, 0  ;;  %785 = vmatpush3.bf16.msra.mxu1 %v858_v41  ;;  %v860_v43 = vld [vmem:[%s1152_s4 + $0x10] sm:$0xff]   ;;  %v861_v44 = vld [vmem:[%s1152_s4 + $0x18] sm:$0xff]   ;;  %vm340_vm6 = vcmask 1041409  }
   0xc   :  { %vm699_vm5 = vmpackc.low %vm52_vm4, %vm50_vm3  ;;  %786 = vmatprep.subr.bf16.mxu1 %v883_v2  ;;  %v862_v45 = vld [vmem:[%s1152_s4 + $0x20] sm:$0xff]   ;;  %v863_v46 = vld [vmem:[%s1152_s4 + $0x28] sm:$0xff]   ;;  %vm344_vm8 = vcmask 1043459  }
   0xd   :  { %v864_v47 = vld [vmem:[%s1152_s4 + $0x30] sm:$0xff]   ;;  %v865_v48 = vld [vmem:[%s1152_s4 + $0x38] sm:$0xff]   ;;  %v1050_v52 = vld [vmem:[%s1153_s2] sm:$0xf] }
   0xe   :  { %198 = vmatpush1.bf16.msra.mxu0 %v851_v5  ;;  %v117_v53 = vrot.slane %v1050_v52, %v116_v51  ;;  %v264_v61 = vld [vmem:[%s1154_s3] sm:$0xff]  ;;  %v265_v62 = vld [vmem:[%s1154_s3 + $0x8] sm:$0xff]  ;;  %v270_v49 = vld [vmem:[%s1154_s3 + $0x30] sm:$0xff] }
   0xf   :  { %199 = vmatprep.subr.bf16.mxu0 %v882_v0  ;;  %787 = vmatpush3.bf16.msra.mxu1 %v859_v42  ;;  %v268_v29 = vld [vmem:[%s1154_s3 + $0x20] sm:$0xff]  ;;  %v269_v30 = vld [vmem:[%s1154_s3 + $0x28] sm:$0xff]  ;;  %v271_v51 = vld [vmem:[%s1154_s3 + $0x38] sm:$0xff] }
  0x10   :  { %788 = vmatprep.subr.bf16.mxu1 %v883_v2 }
  0x12   :  { %200 = vmatpush1.bf16.msra.mxu0 %v852_v11 }
  0x13   :  { %201 = vmatprep.subr.bf16.mxu0 %v882_v0  ;;  %789 = vmatpush3.bf16.msra.mxu1 %v860_v43 }
  0x14   :  { %790 = vmatprep.subr.bf16.mxu1 %v883_v2 }
  0x16   :  { %202 = vmatpush1.bf16.msra.mxu0 %v853_v12  ;;  %v266_v12 = vld [vmem:[%s1154_s3 + $0x10] sm:$0xff] }
  0x17   :  { %203 = vmatprep.subr.bf16.mxu0 %v882_v0  ;;  %791 = vmatpush3.bf16.msra.mxu1 %v861_v44 }
  0x18   :  { %792 = vmatprep.subr.bf16.mxu1 %v883_v2 }
  0x1a   :  { %204 = vmatpush1.bf16.msra.mxu0 %v854_v13  ;;  %v267_v13 = vld [vmem:[%s1154_s3 + $0x18] sm:$0xff] }
  0x1b   :  { %205 = vmatprep.subr.bf16.mxu0 %v882_v0  ;;  %793 = vmatpush3.bf16.msra.mxu1 %v862_v45 }
  0x1c   :  { %794 = vmatprep.subr.bf16.mxu1 %v883_v2 }
  0x1e   :  { %206 = vmatpush1.bf16.msra.mxu0 %v855_v14 }
  0x1f   :  { %207 = vmatprep.subr.bf16.mxu0 %v882_v0  ;;  %795 = vmatpush3.bf16.msra.mxu1 %v863_v46 }
  0x20   :  { %796 = vmatprep.subr.bf16.mxu1 %v883_v2 }
  0x22   :  { %208 = vmatpush1.bf16.msra.mxu0 %v856_v17 }
  0x23   :  { %209 = vmatprep.subr.bf16.mxu0 %v882_v0  ;;  %797 = vmatpush3.bf16.msra.mxu1 %v864_v47 }
  0x24   :  { %798 = vmatprep.subr.bf16.mxu1 %v883_v2 }
  0x26   :  { %210 = vmatpush1.bf16.msra.mxu0 %v857_v20 }
  0x27   :  { %824 = vmatprep.subr.bf16.mxu0 %v883_v2  ;;  %799 = vmatpush3.bf16.msra.mxu1 %v865_v48 }
  0x28   :  { %804 = vmatprep.subr.bf16.mxu1 %v883_v2 }
  0x29   :  { %691 = vmatmul.mubr.msk.bf16.vlgmr.msra.gmra.mrb[0].mxu0 %vm690_vm7, %v884_v28  ;;  %vm342_vm7 = vcmask 1042434  }
  0x2a   :  { %692 = vmatprep.mubr.msk.bf16.mxu0 %vm178_vm2, %v89_v25 }
  0x31   :  { %694 = vmatmul.mubr.msk.bf16.gmra.mrb[4].mxu0 %vm693_vm12, %v884_v28 }
  0x32   :  { %695 = vmatprep.mubr.msk.bf16.mxu0 %vm178_vm2, %v91_v33 }
  0x39   :  { %697 = vmatmul.mubr.msk.bf16.gmra.mrb[8].mxu0 %vm696_vm1, %v884_v28 }
  0x3a   :  { %698 = vmatprep.mubr.msk.bf16.mxu0 %vm178_vm2, %v93_v38  ;;  %vm885_vm2 = vmmov 0  }
  0x3b   :  { %800 = vmatprep.mubr.msk.bf16.mxu1 %vm885_vm2, %v883_v2 }
  0x41   :  { %700 = vmatmul.mubr.msk.bf16.gmra.mrb[12].mxu0 %vm699_vm5, %v884_v28 }
  0x42   :  { %840 = vmatprep.mubr.msk.bf16.mxu0 %vm885_vm2, %v883_v2 }
  0xfc   :  { %v225_v54 = vpop.f32.mrb[0].mxu0 }
  0xfd   :  { %v226_v55 = vadd.f32 %v225_v54, %v117_v53  ;;  %v227_v56 = vpop.f32.mrb[1].mxu0 }
  0xfe   :  { %v228_v57 = vpop.f32.mrb[2].mxu0 }
  0xff   :  { %v256_v58 = vmax.f32 %v226_v55, 0.0  ;;  %v229_v59 = vadd.f32 %v228_v57, %v117_v53  ;;  %v230_v60 = vpop.f32.mrb[3].mxu0 }
 0x101   :  { %v257_v63 = vmax.f32 %v229_v59, 0.0  ;;  %v272_v0 = vmul.f32 %v264_v61, %v256_v58 }
 0x103   :  { %v273_v1 = vmul.f32 %v265_v62, %v257_v63 }
 0x104   :  { %v233_v3 = vpop.f32.mrb[4].mxu0 }
 0x105   :  { %v280_v4 = vmax.f32 %v272_v0, %v273_v1  ;;  %v234_v5 = vadd.f32 %v233_v3, %v117_v53  ;;  %v235_v6 = vpop.f32.mrb[5].mxu0 }
 0x106   :  { %v236_v7 = vpop.f32.mrb[6].mxu0 }
 0x107   :  { %v281_v8 = vrot.slane %v280_v4, 4  ;;  %v258_v9 = vmax.f32 %v234_v5, 0.0  ;;  %v237_v10 = vadd.f32 %v236_v7, %v117_v53  ;;  %v238_v11 = vpop.f32.mrb[7].mxu0 }
 0x109   :  { %v282_v14 = vmax.f32 %v280_v4, %v281_v8  ;;  %v259_v15 = vmax.f32 %v237_v10, 0.0  ;;  %v274_v17 = vmul.f32 %v266_v12, %v258_v9 }
 0x10b   :  { %v283_v16 = vrot.slane %v282_v14, 2  ;;  %v275_v18 = vmul.f32 %v267_v13, %v259_v15 }
 0x10c   :  { %v241_v19 = vpop.f32.mrb[8].mxu0 }
 0x10d   :  { %v284_v20 = vmax.f32 %v282_v14, %v283_v16  ;;  %v287_v21 = vmax.f32 %v274_v17, %v275_v18  ;;  %v242_v22 = vadd.f32 %v241_v19, %v117_v53  ;;  %v243_v23 = vpop.f32.mrb[9].mxu0  ;;  %v866_v17 = vld [vmem:[%s1152_s4 + $0x40] sm:$0xff]   ;;  %v867_v19 = vld [vmem:[%s1152_s4 + $0x48] sm:$0xff]  }
 0x10e   :  { %v244_v24 = vpop.f32.mrb[10].mxu0  ;;  %v871_v23 = vld [vmem:[%s1152_s4 + $0x68] sm:$0xff]  }
 0x10f   :  { %v288_v25 = vrot.slane %v287_v21, 4  ;;  %v260_v26 = vmax.f32 %v242_v22, 0.0  ;;  %v245_v27 = vadd.f32 %v244_v24, %v117_v53  ;;  %v246_v28 = vpop.f32.mrb[11].mxu0  ;;  %v285_v31 = vrot.slane %v284_v20, 1  ;;  %v870_v22 = vld [vmem:[%s1152_s4 + $0x60] sm:$0xff]   ;;  %v872_v24 = vld [vmem:[%s1152_s4 + $0x70] sm:$0xff]  }
 0x110   :  { %v876_v28 = vld [vmem:[%s1152_s4 + $0x90] sm:$0xff]  }
 0x111   :  { %v289_v32 = vmax.f32 %v287_v21, %v288_v25  ;;  %v261_v33 = vmax.f32 %v245_v27, 0.0  ;;  %v276_v35 = vmul.f32 %v268_v29, %v260_v26  ;;  %v286_v38 = vmax.f32 %v284_v20, %v285_v31  ;;  %v868_v20 = vld [vmem:[%s1152_s4 + $0x50] sm:$0xff]   ;;  %v869_v21 = vld [vmem:[%s1152_s4 + $0x58] sm:$0xff]   ;;  %v874_v26 = vld [vmem:[%s1152_s4 + $0x80] sm:$0xff]  }
 0x112   :  { %v873_v25 = vld [vmem:[%s1152_s4 + $0x78] sm:$0xff]   ;;  %825 = vmatpush3.bf16.msra.mxu0 %v874_v26  ;;  %v875_v27 = vld [vmem:[%s1152_s4 + $0x88] sm:$0xff]  }
 0x113   :  { %v290_v34 = vrot.slane %v289_v32, 2  ;;  %v277_v36 = vmul.f32 %v269_v30, %v261_v33  ;;  %v308_v54 = vpack.c.bf16 %v286_v38, %v286_v38  ;;  %826 = vmatprep.subr.bf16.mxu0 %v883_v2  ;;  %v877_v29 = vld [vmem:[%s1152_s4 + $0x98] sm:$0xff]   ;;  %v878_v30 = vld [vmem:[%s1152_s4 + $0xa0] sm:$0xff]   ;;  %v879_v31 = vld [vmem:[%s1152_s4 + $0xa8] sm:$0xff]   ;;  %v330_v33 = vsub.s32 1, %v1044_v50 }
 0x114   :  { %v249_v37 = vpop.f32.mrb[12].mxu0 }
 0x115   :  { %v291_v39 = vmax.f32 %v289_v32, %v290_v34  ;;  %v294_v40 = vmax.f32 %v276_v35, %v277_v36  ;;  %v250_v41 = vadd.f32 %v249_v37, %v117_v53  ;;  %v251_v42 = vpop.f32.mrb[13].mxu0  ;;  %v336_v62 = vunpack.c.l.b16 %v308_v54  ;;  %v880_v32 = vld [vmem:[%s1152_s4 + $0xb0] sm:$0xff]  }
 0x116   :  { %v252_v43 = vpop.f32.mrb[14].mxu0  ;;  %827 = vmatpush3.bf16.msra.mxu0 %v875_v27  ;;  %v331_v34 = vrot.slane %v1050_v52, %v330_v33  ;;  %v881_v42 = vld [vmem:[%s1152_s4 + $0xb8] sm:$0xff]   ;;  %v568_v54 = vsub.s32 3, %v1044_v50 }
 0x117   :  { %v292_v44 = vrot.slane %v291_v39, 1  ;;  %v295_v45 = vrot.slane %v294_v40, 4  ;;  %v262_v46 = vmax.f32 %v250_v41, 0.0  ;;  %v253_v47 = vadd.f32 %v252_v43, %v117_v53  ;;  %v254_v48 = vpop.f32.mrb[15].mxu0  ;;  %828 = vmatprep.subr.bf16.mxu0 %v883_v2 }
 0x118   :  { %v457_v43 = vsub.s32 2, %v1044_v50 }
 0x119   :  { %v293_v55 = vmax.f32 %v291_v39, %v292_v44  ;;  %v296_v56 = vmax.f32 %v294_v40, %v295_v45  ;;  %v263_v57 = vmax.f32 %v253_v47, 0.0  ;;  %v278_v60 = vmul.f32 %v270_v49, %v262_v46 }
 0x11a   :  { %829 = vmatpush3.bf16.msra.mxu0 %v876_v28 }
 0x11b   :  { %v309_v58 = vpack.c.bf16 %v293_v55, %v293_v55  ;;  %v297_v59 = vrot.slane %v296_v56, 2  ;;  %v279_v61 = vmul.f32 %v271_v51, %v263_v57  ;;  %830 = vmatprep.subr.bf16.mxu0 %v883_v2  ;;  %v569_v55 = vrot.slane %v1050_v52, %v568_v54 }
 0x11d   :  { %v337_v53 = vunpack.c.l.b16 %v309_v58  ;;  %v298_v63 = vmax.f32 %v296_v56, %v297_v59  ;;  %v301_v0 = vmax.f32 %v278_v60, %v279_v61 }
 0x11e   :  { %831 = vmatpush3.bf16.msra.mxu0 %v877_v29 }
 0x11f   :  { %v299_v1 = vrot.slane %v298_v63, 1  ;;  %v302_v3 = vrot.slane %v301_v0, 4  ;;  %v341_v4 = vsel %vm340_vm6, %v337_v53, %v336_v62  ;;  %832 = vmatprep.subr.bf16.mxu0 %v883_v2 }
 0x121   :  { %v300_v5 = vmax.f32 %v298_v63, %v299_v1  ;;  %v303_v6 = vmax.f32 %v301_v0, %v302_v3 }
 0x122   :  { %833 = vmatpush3.bf16.msra.mxu0 %v878_v30 }
 0x123   :  { %v304_v7 = vrot.slane %v303_v6, 2  ;;  %v310_v8 = vpack.c.bf16 %v300_v5, %v300_v5  ;;  %834 = vmatprep.subr.bf16.mxu0 %v883_v2 }
 0x125   :  { %v305_v9 = vmax.f32 %v303_v6, %v304_v7  ;;  %v338_v10 = vunpack.c.l.b16 %v310_v8 }
 0x126   :  { %835 = vmatpush3.bf16.msra.mxu0 %v879_v31 }
 0x127   :  { %v306_v11 = vrot.slane %v305_v9, 1  ;;  %v343_v12 = vsel %vm342_vm7, %v338_v10, %v341_v4  ;;  %836 = vmatprep.subr.bf16.mxu0 %v883_v2 }
 0x129   :  { %v307_v13 = vmax.f32 %v305_v9, %v306_v11 }
 0x12a   :  { %837 = vmatpush3.bf16.msra.mxu0 %v880_v32 }
 0x12b   :  { %v311_v14 = vpack.c.bf16 %v307_v13, %v307_v13  ;;  %838 = vmatprep.subr.bf16.mxu0 %v883_v2 }
 0x12d   :  { %v339_v15 = vunpack.c.l.b16 %v311_v14 }
 0x12e   :  { %839 = vmatpush3.bf16.msra.mxu0 %v881_v42 }
 0x12f   :  { %v345_v16 = vsel %vm344_vm8, %v339_v15, %v343_v12 }
 0x130   :  { %v346_v18 = vpack.c.b16 %v345_v16, %v345_v16 }
 0x132   :  { %801 = vmatmul.mubr.bf16.vlgmr.msra.gmra.mrb[0].mxu1 %v346_v18 }
 0x133   :  { %805 = vmatpush3.bf16.msra.mxu1 %v866_v17  ;;  %820 = vmatprep.mubr.msk.bf16.mxu1 %vm885_vm2, %v883_v2 }
 0x134   :  { %806 = vmatprep.subr.bf16.mxu1 %v883_v2 }
 0x137   :  { %807 = vmatpush3.bf16.msra.mxu1 %v867_v19 }
 0x138   :  { %808 = vmatprep.subr.bf16.mxu1 %v883_v2 }
 0x13b   :  { %809 = vmatpush3.bf16.msra.mxu1 %v868_v20 }
 0x13c   :  { %810 = vmatprep.subr.bf16.mxu1 %v883_v2 }
 0x13f   :  { %811 = vmatpush3.bf16.msra.mxu1 %v869_v21 }
 0x140   :  { %812 = vmatprep.subr.bf16.mxu1 %v883_v2 }
 0x143   :  { %813 = vmatpush3.bf16.msra.mxu1 %v870_v22 }
 0x144   :  { %814 = vmatprep.subr.bf16.mxu1 %v883_v2 }
 0x147   :  { %815 = vmatpush3.bf16.msra.mxu1 %v871_v23 }
 0x148   :  { %816 = vmatprep.subr.bf16.mxu1 %v883_v2 }
 0x14b   :  { %817 = vmatpush3.bf16.msra.mxu1 %v872_v24 }
 0x14c   :  { %818 = vmatprep.subr.bf16.mxu1 %v883_v2  ;;  %v458_v2 = vrot.slane %v1050_v52, %v457_v43 }
 0x14f   :  { %819 = vmatpush3.bf16.msra.mxu1 %v873_v25 }
 0x205   :  { %v430_v35 = vpop.f32.mrb[0].mxu1 }
 0x206   :  { %v431_v36 = vadd.f32 %v430_v35, %v331_v34  ;;  %v802_v37 = vpop.f32.mrb[1].mxu1 }
 0x207   :  { %v433_v38 = vpop.f32.mrb[2].mxu1 }
 0x208   :  { %v436_v39 = vmax.f32 %v431_v36, 0.0  ;;  %v803_v40 = vpop.f32.mrb[3].mxu1 }
 0x20a   :  { %v437_v41 = vpack.c.bf16 %v436_v39, %v436_v39 }
 0x20c   :  { %821 = vmatmul.mubr.bf16.vlgmr.msra.gmra.mrb[4].mxu1 %v437_v41 }
 0x2df   :  { %v541_v44 = vpop.f32.mrb[4].mxu1 }
 0x2e0   :  { %v542_v45 = vadd.f32 %v541_v44, %v458_v2  ;;  %v822_v46 = vpop.f32.mrb[5].mxu1 }
 0x2e1   :  { %v544_v47 = vpop.f32.mrb[6].mxu1 }
 0x2e2   :  { %v547_v48 = vmax.f32 %v542_v45, 0.0  ;;  %v823_v49 = vpop.f32.mrb[7].mxu1 }
 0x2e4   :  { %v548_v51 = vpack.c.bf16 %v547_v48, %v547_v48 }
 0x2e6   :  { %841 = vmatmul.mubr.bf16.vlgmr.msra.gmra.mrb[16].mxu0 %v548_v51 }
 0x3b9   :  { %v652_v56 = vpop.f32.mrb[16].mxu0 }
 0x3ba   :  { %v653_v57 = vadd.f32 %v652_v56, %v569_v55  ;;  %v842_v58 = vpop.f32.mrb[17].mxu0 }
 0x3bb   :  { %v655_v59 = vpop.f32.mrb[18].mxu0 }
 0x3bc   :  { %658 = vst [vmem:[%s1155_s5] sm:$0xf] %v653_v57  ;;  %v843_v60 = vpop.f32.mrb[19].mxu0 }

</bundles_post_ra>
